<compile_context>
chip_gen: v5e
topology: v5e:2x2
jax: 0.10.0
libtpu: 0.0.40
codegen_flags: <defaults>
</compile_context>

<pallas_src>
import jax
import jax.numpy as jnp
from jax import lax
from jax.experimental import pallas as pl
from jax.experimental.pallas import tpu as pltpu


def _round_up(x, m):
    return ((x + m - 1) // m) * m


def _online_net_kernel(x_ref, w1_ref, b1_ref, w2_ref, b2_ref, o_ref):
    # fc1: contract x's feature dim against w1's in-features dim directly.
    # dot_general(((1,),(1,))) feeds the MXU from the (out,in) layout with no
    # materialized transpose; accumulate in f32.
    h = lax.dot_general(
        x_ref[...], w1_ref[...],
        dimension_numbers=(((1,), (1,)), ((), ())),
        preferred_element_type=jnp.float32,
    ) + b1_ref[...]
    # ReLU epilogue stays in f32 (cheap on the VPU, exact vs. PyTorch, and
    # v5e has no bf16 VPU anyway).
    h = jnp.maximum(h, 0.0)
    # out: (TB, H_pad) x (A_pad, H_pad) -> (TB, A_pad), contracting dim 1 of
    # both. Cast the LHS to the weight dtype (no-op on the f32 path, enables
    # bf16 MXU operands on the bf16 path).
    o_ref[...] = (lax.dot_general(
        h.astype(w2_ref.dtype), w2_ref[...],
        dimension_numbers=(((1,), (1,)), ((), ())),
        preferred_element_type=jnp.float32,
    ) + b2_ref[...]).astype(o_ref.dtype)


def prepare_params(w1, b1, w2, b2, *, param_dtype=jnp.float32):
    """One-time parameter prep (call once, outside the step loop).

    Pads hidden_size and n_actions up to multiples of 128 (min 128) with zeros
    so every vector tile in the kernel is lane-dense and the output store is a
    full-lane unmasked vst. Zero rows/cols contribute exactly zero, so the
    real logits are unchanged.

    w1: (H, n_states); b1: (1, H); w2: (A, H); b2: (1, A)
    Returns (w1p, b1p, w2p, b2p) with shapes
      (H_pad, n_states), (1, H_pad), (A_pad, H_pad), (1, A_pad).
    Set param_dtype=jnp.bfloat16 on v6e/v7x at scaled-up sizes for ~2x MXU
    throughput (biases stay f32).
    """
    H, n_states = w1.shape
    A = w2.shape[0]
    H_pad = max(128, _round_up(H, 128))
    A_pad = max(128, _round_up(A, 128))

    w1p = jnp.zeros((H_pad, n_states), param_dtype).at[:H, :].set(
        w1.astype(param_dtype))
    b1p = jnp.zeros((1, H_pad), jnp.float32).at[:, :H].set(
        b1.astype(jnp.float32))
    w2p = jnp.zeros((A_pad, H_pad), param_dtype).at[:A, :H].set(
        w2.astype(param_dtype))
    b2p = jnp.zeros((1, A_pad), jnp.float32).at[:, :A].set(
        b2.astype(jnp.float32))
    return w1p, b1p, w2p, b2p


def online_net_forward(x, w1p, b1p, w2p, b2p, *, tb=2048):
    """Fused fc1 -> ReLU -> out forward.

    x: (B, n_states) — cast to the weight dtype for the MXU feed.
    Params must come from prepare_params (padded layout).
    Returns the padded (B, A_pad) f32 logits; columns >= n_actions are exactly
    zero. The consumer should slice/fuse `[:, :n_actions]` itself to avoid an
    extra standalone HBM pass.
    """
    B, n_states = x.shape
    H_pad = w1p.shape[0]
    A_pad = w2p.shape[0]

    x = x.astype(w1p.dtype)

    # Batch tile: big (amortizes per-grid-step overhead), multiple of 8, and
    # at least 2 grid steps when B >= 16 so the "parallel" axis can shard
    # across v7x's two TensorCores.
    if B <= tb:
        TB = B
        if B >= 16:
            TB = _round_up((B + 1) // 2, 8)
    else:
        TB = _round_up(tb, 8)
    grid = (pl.cdiv(B, TB),)

    # Advisory cost so XLA overlaps this custom call sensibly.
    itemsize = jnp.dtype(w1p.dtype).itemsize
    flops = 2 * B * (n_states * H_pad + H_pad * A_pad)
    bytes_accessed = (B * n_states * itemsize            # x in
                      + H_pad * n_states * itemsize      # w1
                      + A_pad * H_pad * itemsize         # w2
                      + (H_pad + A_pad) * 4              # biases
                      + B * A_pad * 4)                   # out
    cost = pl.CostEstimate(flops=int(flops), transcendentals=0,
                           bytes_accessed=int(bytes_accessed))

    out_padded = pl.pallas_call(
        _online_net_kernel,
        out_shape=jax.ShapeDtypeStruct((B, A_pad), jnp.float32),
        grid_spec=pltpu.PrefetchScalarGridSpec(
            num_scalar_prefetch=0,
            grid=grid,
            in_specs=[
                pl.BlockSpec((TB, n_states), lambda i: (i, 0)),    # x tile
                pl.BlockSpec((H_pad, n_states), lambda i: (0, 0)),  # w1 resident
                pl.BlockSpec((1, H_pad), lambda i: (0, 0)),         # b1 resident
                pl.BlockSpec((A_pad, H_pad), lambda i: (0, 0)),     # w2 resident
                pl.BlockSpec((1, A_pad), lambda i: (0, 0)),         # b2 resident
            ],
            out_specs=pl.BlockSpec((TB, A_pad), lambda i: (i, 0)),
        ),
        compiler_params=pltpu.CompilerParams(
            dimension_semantics=("parallel",)),
        cost_estimate=cost,
    )(x, w1p, b1p, w2p, b2p)

    return out_padded


def init_params(key, n_states, n_actions, hidden_size):
    """Mirror the PyTorch module: weights ~ N(0, 0.1); biases keep the
    nn.Linear default U(-1/sqrt(fan_in), +1/sqrt(fan_in))."""
    k1, k2, k3, k4 = jax.random.split(key, 4)
    w1 = 0.1 * jax.random.normal(k1, (hidden_size, n_states), dtype=jnp.float32)
    w2 = 0.1 * jax.random.normal(k2, (n_actions, hidden_size), dtype=jnp.float32)
    bnd1 = 1.0 / jnp.sqrt(jnp.float32(n_states))
    bnd2 = 1.0 / jnp.sqrt(jnp.float32(hidden_size))
    b1 = jax.random.uniform(k3, (1, hidden_size), jnp.float32, -bnd1, bnd1)
    b2 = jax.random.uniform(k4, (1, n_actions), jnp.float32, -bnd2, bnd2)
    return w1, b1, w2, b2


if __name__ == "__main__":
    n_states, n_actions, hidden_size = 16, 4, 32
    batch = 8

    key = jax.random.PRNGKey(0)
    kx, kp = jax.random.split(key)
    x = jax.random.normal(kx, (batch, n_states), dtype=jnp.float32)
    w1, b1, w2, b2 = init_params(kp, n_states, n_actions, hidden_size)

    # One-time parameter prep (padding hoisted out of the per-step forward).
    w1p, b1p, w2p, b2p = prepare_params(w1, b1, w2, b2)

    out_padded = online_net_forward(x, w1p, b1p, w2p, b2p)
    out_padded = jax.block_until_ready(out_padded)

    # Slice the real actions only for the correctness check (a real consumer
    # would fuse this slice into its own downstream op).
    out = out_padded[:, :n_actions]

    # Pure-JAX reference of the same forward pass.
    ref = jnp.maximum(x @ w1.T + b1, 0.0) @ w2.T + b2
    assert out.shape == (batch, n_actions)
    assert jnp.allclose(out, ref, atol=1e-5, rtol=1e-5)
    # Padded columns must be exactly zero.
    assert jnp.all(out_padded[:, n_actions:] == 0.0)

    print("KERNEL_OK")
</pallas_src>

<mosaic_0001>
module attributes {stable_mosaic.version = 11 : i64} {
  func.func @_online_net_kernel(%arg0: i32, %arg1: memref<8x16xf32, #tpu.memory_space<vmem>>, %arg2: memref<128x16xf32, #tpu.memory_space<vmem>>, %arg3: memref<1x128xf32, #tpu.memory_space<vmem>>, %arg4: memref<128x128xf32, #tpu.memory_space<vmem>>, %arg5: memref<1x128xf32, #tpu.memory_space<vmem>>, %arg6: memref<8x128xf32, #tpu.memory_space<vmem>>) attributes {dimension_semantics = [#tpu.dimension_semantics<parallel>], iteration_bounds = array<i64: 1>, scalar_prefetch = 0 : i64, scratch_operands = 0 : i64, tpu.core_type = #tpu.core_type<tc>, window_params = [{transform_indices = @transform_0, window_bounds = array<i64: 8, 16>}, {pipeline_mode = #tpu.pipeline_mode<synchronous>, transform_indices = @transform_1, window_bounds = array<i64: 128, 16>}, {pipeline_mode = #tpu.pipeline_mode<synchronous>, transform_indices = @transform_2, window_bounds = array<i64: 1, 128>}, {pipeline_mode = #tpu.pipeline_mode<synchronous>, transform_indices = @transform_3, window_bounds = array<i64: 128, 128>}, {pipeline_mode = #tpu.pipeline_mode<synchronous>, transform_indices = @transform_4, window_bounds = array<i64: 1, 128>}, {transform_indices = @transform_5, window_bounds = array<i64: 8, 128>}]} {
    %c0 = arith.constant 0 : index
    %c0_0 = arith.constant 0 : index
    %0 = vector.load %arg1[%c0, %c0_0] : memref<8x16xf32, #tpu.memory_space<vmem>>, vector<8x16xf32>
    %c0_1 = arith.constant 0 : index
    %c0_2 = arith.constant 0 : index
    %1 = vector.load %arg2[%c0_1, %c0_2] : memref<128x16xf32, #tpu.memory_space<vmem>>, vector<128x16xf32>
    %cst = arith.constant dense<0.000000e+00> : vector<8x128xf32>
    %2 = tpu.matmul %0, %1, %cst {dimension_numbers = #tpu.dot_dimension_numbers<[1], [1], [0], [0], [0, 0, 1, 0], [], []>} : vector<8x16xf32>, vector<128x16xf32>, vector<8x128xf32> -> vector<8x128xf32>
    %c0_3 = arith.constant 0 : index
    %c0_4 = arith.constant 0 : index
    %3 = vector.load %arg3[%c0_3, %c0_4] : memref<1x128xf32, #tpu.memory_space<vmem>>, vector<1x128xf32>
    %4 = vector.broadcast %3 : vector<1x128xf32> to vector<8x128xf32>
    %5 = arith.addf %2, %4 : vector<8x128xf32>
    %cst_5 = arith.constant 0.000000e+00 : f32
    %6 = vector.broadcast %cst_5 : f32 to vector<8x128xf32>
    %7 = arith.maximumf %5, %6 : vector<8x128xf32>
    %c0_6 = arith.constant 0 : index
    %c0_7 = arith.constant 0 : index
    %8 = vector.load %arg4[%c0_6, %c0_7] : memref<128x128xf32, #tpu.memory_space<vmem>>, vector<128x128xf32>
    %cst_8 = arith.constant dense<0.000000e+00> : vector<8x128xf32>
    %9 = tpu.matmul %7, %8, %cst_8 {dimension_numbers = #tpu.dot_dimension_numbers<[1], [1], [0], [0], [0, 0, 1, 0], [], []>} : vector<8x128xf32>, vector<128x128xf32>, vector<8x128xf32> -> vector<8x128xf32>
    %c0_9 = arith.constant 0 : index
    %c0_10 = arith.constant 0 : index
    %10 = vector.load %arg5[%c0_9, %c0_10] : memref<1x128xf32, #tpu.memory_space<vmem>>, vector<1x128xf32>
    %11 = vector.broadcast %10 : vector<1x128xf32> to vector<8x128xf32>
    %12 = arith.addf %9, %11 : vector<8x128xf32>
    %c0_11 = arith.constant 0 : index
    %c0_12 = arith.constant 0 : index
    %13 = vector.load %arg6[%c0_11, %c0_12] : memref<8x128xf32, #tpu.memory_space<vmem>>, vector<8x128xf32>
    tpu.vector_store %arg6[%c0_11, %c0_12], %12 {strides = array<i32>} : memref<8x128xf32, #tpu.memory_space<vmem>>, vector<8x128xf32>,
    return
  }
  func.func @transform_0(%arg0: i32) -> (i32, i32) {
    %c0_i32 = arith.constant 0 : i32
    %c0_i32_0 = arith.constant 0 : i32
    return %arg0, %c0_i32 : i32, i32
  }
  func.func @transform_1(%arg0: i32) -> (i32, i32) {
    %c0_i32 = arith.constant 0 : i32
    %c0_i32_0 = arith.constant 0 : i32
    %c0_i32_1 = arith.constant 0 : i32
    return %c0_i32, %c0_i32_0 : i32, i32
  }
  func.func @transform_2(%arg0: i32) -> (i32, i32) {
    %c0_i32 = arith.constant 0 : i32
    %c0_i32_0 = arith.constant 0 : i32
    %c0_i32_1 = arith.constant 0 : i32
    return %c0_i32, %c0_i32_0 : i32, i32
  }
  func.func @transform_3(%arg0: i32) -> (i32, i32) {
    %c0_i32 = arith.constant 0 : i32
    %c0_i32_0 = arith.constant 0 : i32
    %c0_i32_1 = arith.constant 0 : i32
    return %c0_i32, %c0_i32_0 : i32, i32
  }
  func.func @transform_4(%arg0: i32) -> (i32, i32) {
    %c0_i32 = arith.constant 0 : i32
    %c0_i32_0 = arith.constant 0 : i32
    %c0_i32_1 = arith.constant 0 : i32
    return %c0_i32, %c0_i32_0 : i32, i32
  }
  func.func @transform_5(%arg0: i32) -> (i32, i32) {
    %c0_i32 = arith.constant 0 : i32
    %c0_i32_0 = arith.constant 0 : i32
    return %arg0, %c0_i32 : i32, i32
  }
}

</mosaic_0001>

<bundles_post_ra>
// kernel: tpu_custom_call.1
= control target key start
LH: loop header
LB: loop body
LE: loop exit
PB: predicated region body
PF: predicated region fallthrough
CT: control target
= control target key end

     0   :  { %vm42_vm0 = vcmask 130048   ;;  %s374_s0 = inlined_call_operand.vmem [shape: f32[8,16], index: 0, kind: input, shape index: {}]   ;;  %s375_s1 = inlined_call_operand.vmem [shape: f32[128,16], index: 1, kind: input, shape index: {}]   ;;  %s376_s2 = inlined_call_operand.vmem [shape: f32[1,128], index: 2, kind: input, shape index: {}]   ;;  %s377_s3 = inlined_call_operand.vmem [shape: f32[128,128], index: 3, kind: input, shape index: {}]   ;;  %s378_s4 = inlined_call_operand.vmem [shape: f32[1,128], index: 4, kind: input, shape index: {}]   ;;  %s379_s5 = inlined_call_operand.hbm [shape: f32[8,128], index: 5, kind: output, shape index: {}]  }
   0x1   :  { %v37_v0 = vld [vmem:[%s375_s1 + $0x78] sm:$0xff]  ;;  %v36_v1 = vld [vmem:[%s375_s1 + $0x70] sm:$0xff] }
   0x2   :  { %172 = vmatpush.xpose.msk.msra.mxu0 %vm42_vm0, %v37_v0 }
   0x3   :  { %10 = vsyncpa [#allocation3], 0  ;;  %v35_v2 = vld [vmem:[%s375_s1 + $0x68] sm:$0xff]  ;;  %v34_v3 = vld [vmem:[%s375_s1 + $0x60] sm:$0xff]  ;;  %s218_s11 = smov [#allocation2]   ;;  %s163_s15 = sshll.u32 %s379_s5, 4  ;;  %s164_s15 = int_to_ptr.hbm [resolvable:$true] %s163_s15 }
   0x4   :  { %v33_v4 = vld [vmem:[%s375_s1 + $0x58] sm:$0xff]  ;;  %v32_v5 = vld [vmem:[%s375_s1 + $0x50] sm:$0xff]  ;;  %v31_v6 = vld [vmem:[%s375_s1 + $0x48] sm:$0xff]  ;;  %s161_s12 = sshll.u32 %s218_s11, 4  ;;  %s162_s12 = int_to_ptr.vmem [resolvable:$true] %s161_s12 }
   0x5   :  { %v30_v7 = vld [vmem:[%s375_s1 + $0x40] sm:$0xff]  ;;  %v29_v8 = vld [vmem:[%s375_s1 + $0x38] sm:$0xff]  ;;  %v28_v10 = vld [vmem:[%s375_s1 + $0x30] sm:$0xff] }
   0x6   :  { %173 = vmatpush.xpose.msk.msra.mxu0 %vm42_vm0, %v36_v1  ;;  %v130_v9 = vld [vmem:[%s377_s3 + $0x78] sm:$0xff]  ;;  %v129_v11 = vld [vmem:[%s377_s3 + $0x70] sm:$0xff]  ;;  %v27_v12 = vld [vmem:[%s375_s1 + $0x28] sm:$0xff] }
   0x7   :  { %135 = vmatpush.xpose.msra.mxu1 %v130_v9  ;;  %v128_v13 = vld [vmem:[%s377_s3 + $0x68] sm:$0xff]  ;;  %v26_v14 = vld [vmem:[%s375_s1 + $0x20] sm:$0xff]  ;;  %v25_v16 = vld [vmem:[%s375_s1 + $0x18] sm:$0xff] }
   0x8   :  { %v127_v15 = vld [vmem:[%s377_s3 + $0x60] sm:$0xff]  ;;  %v126_v17 = vld [vmem:[%s377_s3 + $0x58] sm:$0xff]  ;;  %v24_v18 = vld [vmem:[%s375_s1 + $0x10] sm:$0xff] }
   0x9   :  { %v125_v19 = vld [vmem:[%s377_s3 + $0x50] sm:$0xff]  ;;  %v23_v20 = vld [vmem:[%s375_s1 + $0x8] sm:$0xff]  ;;  %v22_v22 = vld [vmem:[%s375_s1] sm:$0xff] }
   0xa   :  { %174 = vmatpush.xpose.msk.msra.mxu0 %vm42_vm0, %v35_v2  ;;  %v124_v21 = vld [vmem:[%s377_s3 + $0x48] sm:$0xff]  ;;  %v123_v23 = vld [vmem:[%s377_s3 + $0x40] sm:$0xff]  ;;  %v122_v25 = vld [vmem:[%s377_s3 + $0x38] sm:$0xff] }
   0xb   :  { %136 = vmatpush.xpose.msra.mxu1 %v129_v11  ;;  %v21_v24 = vld [vmem:[%s374_s0] sm:$0xff]  ;;  %v121_v26 = vld [vmem:[%s377_s3 + $0x30] sm:$0xff]  ;;  %v120_v27 = vld [vmem:[%s377_s3 + $0x28] sm:$0xff] }
   0xc   :  { %v119_v28 = vld [vmem:[%s377_s3 + $0x20] sm:$0xff]  ;;  %v118_v29 = vld [vmem:[%s377_s3 + $0x18] sm:$0xff]  ;;  %v117_v30 = vld [vmem:[%s377_s3 + $0x10] sm:$0xff] }
   0xd   :  { %v116_v31 = vld [vmem:[%s377_s3 + $0x8] sm:$0xff]  ;;  %v115_v32 = vld [vmem:[%s377_s3] sm:$0xff] }
   0xe   :  { %175 = vmatpush.xpose.msk.msra.mxu0 %vm42_vm0, %v34_v3  ;;  %v190_v33 = vld [vmem:[%s376_s2] ss:$0 sm:$0xff] }
   0xf   :  { %137 = vmatpush.xpose.msra.mxu1 %v128_v13  ;;  %v191_v37 = vld [vmem:[%s378_s4] ss:$0 sm:$0xff] }
  0x12   :  { %176 = vmatpush.xpose.msk.msra.mxu0 %vm42_vm0, %v33_v4 }
  0x13   :  { %138 = vmatpush.xpose.msra.mxu1 %v127_v15 }
  0x16   :  { %177 = vmatpush.xpose.msk.msra.mxu0 %vm42_vm0, %v32_v5 }
  0x17   :  { %139 = vmatpush.xpose.msra.mxu1 %v126_v17 }
  0x1a   :  { %178 = vmatpush.xpose.msk.msra.mxu0 %vm42_vm0, %v31_v6 }
  0x1b   :  { %140 = vmatpush.xpose.msra.mxu1 %v125_v19 }
  0x1e   :  { %179 = vmatpush.xpose.msk.msra.mxu0 %vm42_vm0, %v30_v7 }
  0x1f   :  { %141 = vmatpush.xpose.msra.mxu1 %v124_v21 }
  0x22   :  { %180 = vmatpush.xpose.msk.msra.mxu0 %vm42_vm0, %v29_v8 }
  0x23   :  { %142 = vmatpush.xpose.msra.mxu1 %v123_v23 }
  0x26   :  { %181 = vmatpush.xpose.msk.msra.mxu0 %vm42_vm0, %v28_v10 }
  0x27   :  { %143 = vmatpush.xpose.msra.mxu1 %v122_v25 }
  0x2a   :  { %182 = vmatpush.xpose.msk.msra.mxu0 %vm42_vm0, %v27_v12 }
  0x2b   :  { %144 = vmatpush.xpose.msra.mxu1 %v121_v26 }
  0x2e   :  { %183 = vmatpush.xpose.msk.msra.mxu0 %vm42_vm0, %v26_v14 }
  0x2f   :  { %145 = vmatpush.xpose.msra.mxu1 %v120_v27 }
  0x32   :  { %184 = vmatpush.xpose.msk.msra.mxu0 %vm42_vm0, %v25_v16 }
  0x33   :  { %146 = vmatpush.xpose.msra.mxu1 %v119_v28 }
  0x36   :  { %185 = vmatpush.xpose.msk.msra.mxu0 %vm42_vm0, %v24_v18 }
  0x37   :  { %147 = vmatpush.xpose.msra.mxu1 %v118_v29 }
  0x3a   :  { %186 = vmatpush.xpose.msk.msra.mxu0 %vm42_vm0, %v23_v20 }
  0x3b   :  { %148 = vmatpush.xpose.msra.mxu1 %v117_v30 }
  0x3e   :  { %187 = vmatpush.xpose.msk.msra.mxu0 %vm42_vm0, %v22_v22 }
  0x3f   :  { %149 = vmatpush.xpose.msra.mxu1 %v116_v31 }
  0x41   :  { %188 = vmatmul.msk.f32.vlgmr.msra.gmra.mxu0 %vm42_vm0, %v21_v24 }
  0x43   :  { %150 = vmatpush.xpose.msra.mxu1 %v115_v32 }
  0xbe   :  { %v111_v34 = vpop.f32.mrf.mxu0 }
  0xbf   :  { %v112_v35 = vadd.f32 %v190_v33, %v111_v34 }
  0xc1   :  { %v114_v36 = vmax.f32 %v112_v35, 0.0 }
  0xc3   :  { %151 = vmatmul.f32.vlgmr.msra.gmra.mxu1 %v114_v36 }
 0x140   :  { %v152_v38 = vpop.f32.mrf.mxu1 }
 0x141   :  { %v153_v39 = vadd.f32 %v191_v37, %v152_v38 }
 0x143   :  { %155 = vst [vmem:[#allocation2] sm:$0xff] %v153_v39 }
 0x144   :  { %166 = dma.vmem_to_hbm [thread:$0]  %s162_s12, 128, %s164_s15, [#allocation3]  }
 0x145   :  { %216 = dma.done.wait [#allocation3], 128  }
 0x146   :  { %217 = vsyncadd [#allocation3], 4294967168 }
 0x147   :  { %171 = vsyncpa [#allocation3], 1 }

</bundles_post_ra>
